<compile_context>
chip_gen: v6e
topology: v6e:2x2x1
jax: 0.10.0
libtpu: 0.0.40
codegen_flags: <defaults>
</compile_context>

<pallas_src>
import functools

import jax
import jax.numpy as jnp
from jax.experimental import pallas as pl
from jax.experimental.pallas import tpu as pltpu

HIDDEN = 64     # fc1 / fc2 width fixed by the PyTorch module
HP = 128        # hidden width padded to one full lane group (lane-dense)
TB_CAP = 4096   # batch-tile cap (keeps f32 temporaries << 16 MiB scoped VMEM on v5e)


def _round_up(x, m):
    return (x + m - 1) // m * m


def _num_tensorcores():
    """Best-effort TensorCore count for 'parallel' grid sharding (v7x has 2)."""
    try:
        kind = jax.devices()[0].device_kind.lower()
    except Exception:
        return 1
    return 2 if "v7" in kind else 1


def _slab_layout(state_size):
    """Row offsets of w1/w2/w3 inside the packed bf16 (rows, 128) weight slab.

    Every region offset/size is a multiple of 16 so bf16 sublane slicing in
    the kernel never crosses a (16, 128) tile boundary (no relayout copies).
    """
    spw = _round_up(state_size, 16)        # padded state width (x lanes / w1 rows)
    o_w1 = 0
    o_w2 = spw
    o_w3 = spw + HP
    rows = spw + 2 * HP
    return spw, rows, (o_w1, o_w2, o_w3)


def pack_params(params, state_size, action_size):
    """Pack params into (bf16 weight slab (rows,128), f32 bias slab (8,128)).

    Padded rows/columns are zero, so after ReLU they stay exactly 0 and
    contribute nothing downstream; padded output columns are zero and are
    sliced away (or ignored) in the wrapper.
    """
    spw, rows, (o_w1, o_w2, o_w3) = _slab_layout(state_size)

    w_slab = jnp.zeros((rows, HP), jnp.float32)
    w_slab = w_slab.at[o_w1:o_w1 + state_size, :HIDDEN].set(params["w1"])
    w_slab = w_slab.at[o_w2:o_w2 + HIDDEN, :HIDDEN].set(params["w2"])
    w_slab = w_slab.at[o_w3:o_w3 + HIDDEN, :action_size].set(params["w3"])
    w_slab = w_slab.astype(jnp.bfloat16)   # pre-cast once; MXU operands are bf16

    b_slab = jnp.zeros((8, HP), jnp.float32)   # biases stay full f32
    b_slab = b_slab.at[0, :HIDDEN].set(params["b1"])
    b_slab = b_slab.at[1, :HIDDEN].set(params["b2"])
    b_slab = b_slab.at[2, :action_size].set(params["b3"])
    return w_slab, b_slab


def _qnet_kernel(x_ref, w_ref, b_ref, o_ref, *, spw, ap):
    # x arrives pre-cast to bf16; weights are bf16; biases + accumulation f32.
    x = x_ref[...]                                           # (tb, spw) bf16

    w1 = w_ref[0:spw, :]                                     # (spw, 128) bf16
    h = jnp.dot(x, w1, preferred_element_type=jnp.float32) + b_ref[0:1, :]
    h = jnp.maximum(h, 0.0)

    w2 = w_ref[spw:spw + HP, :]                              # (128, 128) bf16
    h = jnp.dot(h.astype(jnp.bfloat16), w2,
                preferred_element_type=jnp.float32) + b_ref[1:2, :]
    h = jnp.maximum(h, 0.0)

    w3 = w_ref[spw + HP:spw + 2 * HP, :]                     # (128, 128) bf16
    q = jnp.dot(h.astype(jnp.bfloat16), w3,
                preferred_element_type=jnp.float32) + b_ref[2:3, :]

    # Lane-narrow store: only the (padded) action columns hit HBM (masked vst).
    o_ref[...] = q[:, :ap]


def simple_q_network_forward(x, packed_params, state_size, action_size,
                             block_b=None, unpad=True):
    """x: (B, state_size) f32.  packed_params: tuple from pack_params().

    Returns (B, action_size) f32 Q-values (or the (bp, ap) padded array if
    unpad=False, letting the consumer fuse argmax/loss without a slice pass).
    """
    B = x.shape[0]
    spw, rows, _ = _slab_layout(state_size)
    ap = _round_up(max(action_size, 1), 8)      # padded action width (lane dim)
    w_slab, b_slab = packed_params

    # --- batch tile selection (TC-aware, VMEM-safe) ---
    n_cores = _num_tensorcores()
    if block_b is not None:
        tb = min(_round_up(block_b, 16), TB_CAP)
    else:
        bp0 = _round_up(B, 16)
        if n_cores >= 2 and bp0 >= 32:
            # >=2 parallel grid steps so both v7x TensorCores get work.
            tb = min(_round_up((bp0 + 1) // 2, 16), TB_CAP)
        else:
            # single TC: fewest (biggest) steps possible.
            tb = min(bp0, TB_CAP)
    bp = _round_up(B, tb)

    # Pad (batch -> bp, state -> spw) and cast to bf16 once, in the wrapper.
    if bp == B and spw == state_size:
        xp = x.astype(jnp.bfloat16)
    else:
        xp = jnp.zeros((bp, spw), jnp.bfloat16).at[:B, :state_size].set(
            x.astype(jnp.bfloat16))

    kernel = functools.partial(_qnet_kernel, spw=spw, ap=ap)

    out = pl.pallas_call(
        kernel,
        out_shape=jax.ShapeDtypeStruct((bp, ap), jnp.float32),
        grid_spec=pltpu.PrefetchScalarGridSpec(
            num_scalar_prefetch=0,
            grid=(bp // tb,),
            in_specs=[
                pl.BlockSpec((tb, spw), lambda i: (i, 0)),    # x tile (bf16)
                pl.BlockSpec((rows, HP), lambda i: (0, 0)),   # bf16 weight slab (resident)
                pl.BlockSpec((8, HP), lambda i: (0, 0)),      # f32 bias slab (resident)
            ],
            out_specs=pl.BlockSpec((tb, ap), lambda i: (i, 0)),  # narrow output
        ),
        compiler_params=pltpu.CompilerParams(
            dimension_semantics=("parallel",),   # shards batch steps across TCs on v7x
        ),
    )(xp, w_slab, b_slab)

    if unpad:
        return out[:B, :action_size]
    return out


def init_params(key, state_size, action_size):
    """Deterministic init mirroring the PyTorch module (weights stored (in, out))."""
    k1, k2, k3, kb1, kb2, kb3 = jax.random.split(key, 6)

    def xavier_uniform(k, fan_in, fan_out):
        limit = jnp.sqrt(6.0 / (fan_in + fan_out))
        return jax.random.uniform(k, (fan_in, fan_out), jnp.float32, -limit, limit)

    def linear_bias(k, fan_in, n):
        bound = 1.0 / jnp.sqrt(fan_in)
        return jax.random.uniform(k, (n,), jnp.float32, -bound, bound)

    return {
        "w1": xavier_uniform(k1, state_size, HIDDEN),
        "b1": linear_bias(kb1, state_size, HIDDEN),
        "w2": xavier_uniform(k2, HIDDEN, HIDDEN),
        "b2": linear_bias(kb2, HIDDEN, HIDDEN),
        "w3": jax.random.uniform(k3, (HIDDEN, action_size), jnp.float32, -0.003, 0.003),
        "b3": linear_bias(kb3, HIDDEN, action_size),
    }


def reference_forward(x, params):
    h1 = jnp.maximum(x @ params["w1"] + params["b1"], 0.0)
    h2 = jnp.maximum(h1 @ params["w2"] + params["b2"], 0.0)
    return h2 @ params["w3"] + params["b3"]


if __name__ == "__main__":
    # LunarLander-v2: state_size=8, action_size=4.
    state_size, action_size = 8, 4

    key = jax.random.PRNGKey(0)
    k_params, k_x1, k_x2, k_x3 = jax.random.split(key, 4)
    params = init_params(k_params, state_size, action_size)
    packed = pack_params(params, state_size, action_size)

    # bf16 matmul operands -> relax tolerance vs the f32 reference.
    TOL = dict(atol=2e-2, rtol=2e-2)

    # 1) tiny batch (single grid step, env-step style).
    x1 = jax.random.normal(k_x1, (8, state_size), jnp.float32)
    out1 = jax.block_until_ready(
        simple_q_network_forward(x1, packed, state_size, action_size))
    ref1 = reference_forward(x1, params)
    assert out1.shape == (8, action_size)
    assert jnp.allclose(out1, ref1, **TOL), "mismatch vs reference (B=8)"

    # 2) non-multiple-of-16 batch with an explicit small block -> multi-step grid.
    x2 = jax.random.normal(k_x2, (61, state_size), jnp.float32)
    out2 = jax.block_until_ready(
        simple_q_network_forward(x2, packed, state_size, action_size, block_b=16))
    ref2 = reference_forward(x2, params)
    assert out2.shape == (61, action_size)
    assert jnp.allclose(out2, ref2, **TOL), "mismatch vs reference (B=61, tiled)"

    # 3) medium replay-style batch with default (TC-aware, big-tile) selection,
    #    consumed padded (no trailing slice pass).
    x3 = jax.random.normal(k_x3, (256, state_size), jnp.float32)
    out3_pad = jax.block_until_ready(
        simple_q_network_forward(x3, packed, state_size, action_size, unpad=False))
    ref3 = reference_forward(x3, params)
    assert out3_pad.shape[1] == 8 and out3_pad.shape[0] >= 256
    assert jnp.allclose(out3_pad[:256, :action_size], ref3, **TOL), \
        "mismatch vs reference (B=256, padded output)"

    print("KERNEL_OK")
</pallas_src>

<mosaic_0001>
module attributes {stable_mosaic.version = 11 : i64} {
  func.func @_qnet_kernel(%arg0: i32, %arg1: memref<16x16xbf16, #tpu.memory_space<vmem>>, %arg2: memref<272x128xbf16, #tpu.memory_space<vmem>>, %arg3: memref<8x128xf32, #tpu.memory_space<vmem>>, %arg4: memref<16x8xf32, #tpu.memory_space<vmem>>) attributes {dimension_semantics = [#tpu.dimension_semantics<parallel>], iteration_bounds = array<i64: 1>, scalar_prefetch = 0 : i64, scratch_operands = 0 : i64, tpu.core_type = #tpu.core_type<tc>, window_params = [{transform_indices = @transform_0, window_bounds = array<i64: 16, 16>}, {pipeline_mode = #tpu.pipeline_mode<synchronous>, transform_indices = @transform_1, window_bounds = array<i64: 272, 128>}, {pipeline_mode = #tpu.pipeline_mode<synchronous>, transform_indices = @transform_2, window_bounds = array<i64: 8, 128>}, {transform_indices = @transform_3, window_bounds = array<i64: 16, 8>}]} {
    %c0 = arith.constant 0 : index
    %c0_0 = arith.constant 0 : index
    %0 = vector.load %arg1[%c0, %c0_0] : memref<16x16xbf16, #tpu.memory_space<vmem>>, vector<16x16xbf16>
    %c0_1 = arith.constant 0 : index
    %c0_2 = arith.constant 0 : index
    %1 = vector.load %arg2[%c0_1, %c0_2] : memref<272x128xbf16, #tpu.memory_space<vmem>>, vector<16x128xbf16>
    %cst = arith.constant dense<0.000000e+00> : vector<16x128xf32>
    %2 = tpu.matmul %0, %1, %cst {dimension_numbers = #tpu.dot_dimension_numbers<[1], [0], [0], [1], [0, 0, 1, 1], [], []>} : vector<16x16xbf16>, vector<16x128xbf16>, vector<16x128xf32> -> vector<16x128xf32>
    %c0_3 = arith.constant 0 : index
    %c0_4 = arith.constant 0 : index
    %3 = vector.load %arg3[%c0_3, %c0_4] : memref<8x128xf32, #tpu.memory_space<vmem>>, vector<1x128xf32>
    %4 = vector.broadcast %3 : vector<1x128xf32> to vector<16x128xf32>
    %5 = arith.addf %2, %4 : vector<16x128xf32>
    %cst_5 = arith.constant 0.000000e+00 : f32
    %6 = vector.broadcast %cst_5 : f32 to vector<16x128xf32>
    %7 = arith.maximumf %5, %6 : vector<16x128xf32>
    %c16 = arith.constant 16 : index
    %c0_6 = arith.constant 0 : index
    %8 = vector.load %arg2[%c16, %c0_6] : memref<272x128xbf16, #tpu.memory_space<vmem>>, vector<128x128xbf16>
    %9 = arith.truncf %7 : vector<16x128xf32> to vector<16x128xbf16>
    %cst_7 = arith.constant dense<0.000000e+00> : vector<16x128xf32>
    %10 = tpu.matmul %9, %8, %cst_7 {dimension_numbers = #tpu.dot_dimension_numbers<[1], [0], [0], [1], [0, 0, 1, 1], [], []>} : vector<16x128xbf16>, vector<128x128xbf16>, vector<16x128xf32> -> vector<16x128xf32>
    %c1 = arith.constant 1 : index
    %c0_8 = arith.constant 0 : index
    %11 = vector.load %arg3[%c1, %c0_8] : memref<8x128xf32, #tpu.memory_space<vmem>>, vector<1x128xf32>
    %12 = vector.broadcast %11 : vector<1x128xf32> to vector<16x128xf32>
    %13 = arith.addf %10, %12 : vector<16x128xf32>
    %cst_9 = arith.constant 0.000000e+00 : f32
    %14 = vector.broadcast %cst_9 : f32 to vector<16x128xf32>
    %15 = arith.maximumf %13, %14 : vector<16x128xf32>
    %c144 = arith.constant 144 : index
    %c0_10 = arith.constant 0 : index
    %16 = vector.load %arg2[%c144, %c0_10] : memref<272x128xbf16, #tpu.memory_space<vmem>>, vector<128x128xbf16>
    %17 = arith.truncf %15 : vector<16x128xf32> to vector<16x128xbf16>
    %cst_11 = arith.constant dense<0.000000e+00> : vector<16x128xf32>
    %18 = tpu.matmul %17, %16, %cst_11 {dimension_numbers = #tpu.dot_dimension_numbers<[1], [0], [0], [1], [0, 0, 1, 1], [], []>} : vector<16x128xbf16>, vector<128x128xbf16>, vector<16x128xf32> -> vector<16x128xf32>
    %c2 = arith.constant 2 : index
    %c0_12 = arith.constant 0 : index
    %19 = vector.load %arg3[%c2, %c0_12] : memref<8x128xf32, #tpu.memory_space<vmem>>, vector<1x128xf32>
    %20 = vector.broadcast %19 : vector<1x128xf32> to vector<16x128xf32>
    %21 = arith.addf %18, %20 : vector<16x128xf32>
    %22 = vector.extract_strided_slice %21 {offsets = [0, 0], sizes = [16, 8], strides = [1, 1]} : vector<16x128xf32> to vector<16x8xf32>
    %c0_13 = arith.constant 0 : index
    %c0_14 = arith.constant 0 : index
    %23 = vector.load %arg4[%c0_13, %c0_14] : memref<16x8xf32, #tpu.memory_space<vmem>>, vector<16x8xf32>
    tpu.vector_store %arg4[%c0_13, %c0_14], %22 {strides = array<i32>} : memref<16x8xf32, #tpu.memory_space<vmem>>, vector<16x8xf32>,
    return
  }
  func.func @transform_0(%arg0: i32) -> (i32, i32) {
    %c0_i32 = arith.constant 0 : i32
    %c0_i32_0 = arith.constant 0 : i32
    return %arg0, %c0_i32 : i32, i32
  }
  func.func @transform_1(%arg0: i32) -> (i32, i32) {
    %c0_i32 = arith.constant 0 : i32
    %c0_i32_0 = arith.constant 0 : i32
    %c0_i32_1 = arith.constant 0 : i32
    return %c0_i32, %c0_i32_0 : i32, i32
  }
  func.func @transform_2(%arg0: i32) -> (i32, i32) {
    %c0_i32 = arith.constant 0 : i32
    %c0_i32_0 = arith.constant 0 : i32
    %c0_i32_1 = arith.constant 0 : i32
    return %c0_i32, %c0_i32_0 : i32, i32
  }
  func.func @transform_3(%arg0: i32) -> (i32, i32) {
    %c0_i32 = arith.constant 0 : i32
    %c0_i32_0 = arith.constant 0 : i32
    return %arg0, %c0_i32 : i32, i32
  }
}

</mosaic_0001>

<bundles_post_ra>
// kernel: tpu_custom_call.1
= control target key start
LH: loop header
LB: loop body
LE: loop exit
PB: predicated region body
PF: predicated region fallthrough
CT: control target
= control target key end

     0   :  { %8 = vsyncpa [#allocation3], 0  ;;  %s593_s0 = inlined_call_operand.hbm [shape: bf16[16,16], index: 0, kind: input, shape index: {}]   ;;  %s594_s1 = inlined_call_operand.hbm [shape: bf16[272,128], index: 1, kind: input, shape index: {}]   ;;  %s595_s2 = inlined_call_operand.hbm [shape: f32[8,128], index: 2, kind: input, shape index: {}]   ;;  %s596_s3 = inlined_call_operand.vmem [shape: f32[16,8], index: 3, kind: output, shape index: {}]  }
   0x1   :  { %9 = vsyncpa [#allocation5], 0  ;;  %s531_s12 = smov [#allocation4]   ;;  %s532_s14 = smov [#allocation2]  }
   0x2   :  { %s27_s13 = sshll.u32 %s531_s12, 4  ;;  %s15_s15 = sshll.u32 %s532_s14, 4  ;;  %s28_s13 = int_to_ptr.vmem [resolvable:$true] %s27_s13  ;;  %s16_s15 = int_to_ptr.vmem [resolvable:$true] %s15_s15 }
   0x3   :  { %s475_s16 = scalar_lea.vmem %s28_s13, 2176  ;;  %p480_p1 = scmp.lt.s32.totalorder %s28_s13, %s28_s13 }
   0x4   :  { %p476_p0 = scmp.ne.s32.totalorder %s28_s13, %s475_s16  ;;  %p481_p2 = scmp.lt.s32.totalorder %s475_s16, %s475_s16 }
   0x6   :  { %p482_p3 = por %p481_p2, %p480_p1 }
   0x8   :  { %p483_p4 = pnand %p482_p3, %p476_p0 }
   0xa   :  { %486 = shalt.err (!%p483_p4)
}
   0xb   :  { %s533_s17 = smov 64   ;;  %s534_s18 = smov 4  }
   0xc   :  { %33 = dma.hbm_to_vmem [thread:$0]  %s594_s1, 2176, %s28_s13, [#allocation5], %s533_s17, %s533_s17, %s534_s18  }
   0xd   :  { %s495_s21 = scalar_lea.vmem %s16_s15, 128  ;;  %p500_p6 = scmp.lt.s32.totalorder %s16_s15, %s16_s15 }
   0xe   :  { %p496_p5 = scmp.ne.s32.totalorder %s16_s15, %s495_s21  ;;  %p501_p7 = scmp.lt.s32.totalorder %s495_s21, %s495_s21 }
  0x10   :  { %p502_p8 = por %p501_p7, %p500_p6 }
  0x12   :  { %p503_p9 = pnand %p502_p8, %p496_p5 }
  0x14   :  { %506 = shalt.err (!%p503_p9)
}
  0x15   :  { %21 = dma.hbm_to_vmem [thread:$0]  %s593_s0, 128, %s16_s15, [#allocation3], %s533_s17, %s533_s17, %s534_s18  }
  0x16   :  { %s535_s24 = smov [#allocation6]  }
  0x17   :  { %s40_s25 = sshll.u32 %s535_s24, 4  ;;  %s41_s25 = int_to_ptr.vmem [resolvable:$true] %s40_s25 }
  0x18   :  { %s515_s26 = scalar_lea.vmem %s41_s25, 128  ;;  %p520_p11 = scmp.lt.s32.totalorder %s41_s25, %s41_s25 }
  0x19   :  { %p516_p10 = scmp.ne.s32.totalorder %s41_s25, %s515_s26  ;;  %p521_p12 = scmp.lt.s32.totalorder %s515_s26, %s515_s26 }
  0x1b   :  { %p522_p13 = por %p521_p12, %p520_p11 }
  0x1d   :  { %p523_p0 = pnand %p522_p13, %p516_p10 }
  0x1f   :  { %526 = shalt.err (!%p523_p0)
}
  0x20   :  { %43 = dma.hbm_to_vmem [thread:$0]  %s595_s2, 128, %s41_s25, [#allocation5]  }
  0x21   :  { %527 = dma.done.wait [#allocation3], 128  }
  0x22   :  { %528 = vsyncadd [#allocation3], 4294967168 }
  0x23   :  { %529 = dma.done.wait [#allocation5], 2304  }
  0x24   :  { %530 = vsyncadd [#allocation5], 4294964992  ;;  %v536_v0 = vmov 0.0   ;;  %vm537_vm0 = vmmov 0   ;;  %v449_v1 = vld [vmem:[#allocation4] sm:$0xff]   ;;  %v450_v2 = vld [vmem:[#allocation2] sm:$0xff]  }
  0x25   :  { %396 = vmatprep.subr.bf16.mxu0 %v536_v0  ;;  %398 = vmatprep.mubr.msk.bf16.mxu0 %vm537_vm0, %v536_v0  ;;  %vm74_vm1 = vcmask 130048   ;;  %v451_v3 = vld [vmem:[#allocation4 + $0x40] sm:$0xff]   ;;  %v452_v4 = vld [vmem:[#allocation4 + $0x38] sm:$0xff]   ;;  %v453_v5 = vld [vmem:[#allocation4 + $0x30] sm:$0xff]   ;;  %vm345_vm2 = vcmask 64512  }
  0x26   :  { %402 = vmatprep.subr.bf16.mxu1 %v536_v0  ;;  %418 = vmatprep.mubr.msk.bf16.mxu1 %vm537_vm0, %v536_v0  ;;  %v454_v6 = vld [vmem:[#allocation4 + $0x28] sm:$0xff]   ;;  %v455_v7 = vld [vmem:[#allocation4 + $0x20] sm:$0xff]   ;;  %v456_v8 = vld [vmem:[#allocation4 + $0x18] sm:$0xff]  }
  0x27   :  { %397 = vmatpush3.bf16.msra.mxu0 %v449_v1  ;;  %403 = vmatpush3.bf16.msra.mxu1 %v451_v3  ;;  %v457_v9 = vld [vmem:[#allocation4 + $0x10] sm:$0xff]   ;;  %v458_v10 = vld [vmem:[#allocation4 + $0x8] sm:$0xff]   ;;  %v459_v11 = vld [vmem:[#allocation4 + $0x80] sm:$0xff]  }
  0x28   :  { %422 = vmatprep.subr.bf16.mxu0 %v536_v0  ;;  %404 = vmatprep.subr.bf16.mxu1 %v536_v0  ;;  %v460_v12 = vld [vmem:[#allocation4 + $0x78] sm:$0xff]   ;;  %v461_v13 = vld [vmem:[#allocation4 + $0x70] sm:$0xff]   ;;  %v462_v14 = vld [vmem:[#allocation4 + $0x68] sm:$0xff]  }
  0x29   :  { %v463_v15 = vld [vmem:[#allocation4 + $0x60] sm:$0xff]   ;;  %v354_v16 = vld [vmem:[#allocation6] ss:$0 sm:$0xff]  ;;  %v464_v26 = vld [vmem:[#allocation4 + $0x58] sm:$0xff]  }
  0x2a   :  { %399 = vmatmul.mubr.msk.bf16.vlgmr.msra.gmra.mxu0 %vm74_vm1, %v450_v2  ;;  %v465_v27 = vld [vmem:[#allocation4 + $0x50] sm:$0xff]   ;;  %v466_v28 = vld [vmem:[#allocation4 + $0x48] sm:$0xff]  }
  0x2b   :  { %438 = vmatprep.mubr.msk.bf16.mxu0 %vm537_vm0, %v536_v0  ;;  %405 = vmatpush3.bf16.msra.mxu1 %v452_v4  ;;  %v358_v29 = vld [vmem:[#allocation6 + $0x1] ss:$0 sm:$0xff]  ;;  %v367_v39 = vld [vmem:[#allocation6 + $0x2] ss:$0 sm:$0xff] }
  0x2c   :  { %406 = vmatprep.subr.bf16.mxu1 %v536_v0  ;;  %423 = vmatpush3.bf16.msra.mxu0 %v459_v11 }
  0x2d   :  { %424 = vmatprep.subr.bf16.mxu0 %v536_v0 }
  0x2f   :  { %407 = vmatpush3.bf16.msra.mxu1 %v453_v5 }
  0x30   :  { %408 = vmatprep.subr.bf16.mxu1 %v536_v0  ;;  %425 = vmatpush3.bf16.msra.mxu0 %v460_v12 }
  0x31   :  { %426 = vmatprep.subr.bf16.mxu0 %v536_v0 }
  0x33   :  { %409 = vmatpush3.bf16.msra.mxu1 %v454_v6 }
  0x34   :  { %410 = vmatprep.subr.bf16.mxu1 %v536_v0  ;;  %427 = vmatpush3.bf16.msra.mxu0 %v461_v13 }
  0x35   :  { %428 = vmatprep.subr.bf16.mxu0 %v536_v0 }
  0x37   :  { %411 = vmatpush3.bf16.msra.mxu1 %v455_v7 }
  0x38   :  { %412 = vmatprep.subr.bf16.mxu1 %v536_v0  ;;  %429 = vmatpush3.bf16.msra.mxu0 %v462_v14 }
  0x39   :  { %430 = vmatprep.subr.bf16.mxu0 %v536_v0 }
  0x3b   :  { %413 = vmatpush3.bf16.msra.mxu1 %v456_v8 }
  0x3c   :  { %414 = vmatprep.subr.bf16.mxu1 %v536_v0  ;;  %431 = vmatpush3.bf16.msra.mxu0 %v463_v15 }
  0x3d   :  { %432 = vmatprep.subr.bf16.mxu0 %v536_v0 }
  0x3f   :  { %415 = vmatpush3.bf16.msra.mxu1 %v457_v9 }
  0x40   :  { %416 = vmatprep.subr.bf16.mxu1 %v536_v0  ;;  %433 = vmatpush3.bf16.msra.mxu0 %v464_v26 }
  0x41   :  { %434 = vmatprep.subr.bf16.mxu0 %v536_v0 }
  0x43   :  { %417 = vmatpush3.bf16.msra.mxu1 %v458_v10 }
  0x44   :  { %435 = vmatpush3.bf16.msra.mxu0 %v465_v27 }
  0x45   :  { %436 = vmatprep.subr.bf16.mxu0 %v536_v0 }
  0x48   :  { %437 = vmatpush3.bf16.msra.mxu0 %v466_v28 }
  0xea   :  { %v112_v17 = vpop.f32.mrf.mxu0 }
  0xeb   :  { %v113_v19 = vadd.f32 %v354_v16, %v112_v17 }
  0xec   :  { %v400_v18 = vpop.f32.mrf.mxu0 }
  0xed   :  { %v119_v23 = vmax.f32 %v113_v19, 0.0 }
  0xee   :  { %v115_v20 = vpop.f32.mrf.mxu0 }
  0xef   :  { %v116_v21 = vadd.f32 %v354_v16, %v115_v20 }
  0xf0   :  { %v401_v22 = vpop.f32.mrf.mxu0 }
  0xf1   :  { %v120_v24 = vmax.f32 %v116_v21, 0.0 }
  0xf3   :  { %v137_v25 = vpack.c.bf16 %v120_v24, %v119_v23 }
  0xf5   :  { %419 = vmatmul.mubr.bf16.vlgmr.msra.gmra.mxu1 %v137_v25 }
 0x1b5   :  { %v225_v30 = vpop.f32.mrf.mxu1 }
 0x1b6   :  { %v226_v32 = vadd.f32 %v358_v29, %v225_v30 }
 0x1b7   :  { %v420_v31 = vpop.f32.mrf.mxu1 }
 0x1b8   :  { %v232_v36 = vmax.f32 %v226_v32, 0.0 }
 0x1b9   :  { %v228_v33 = vpop.f32.mrf.mxu1 }
 0x1ba   :  { %v229_v34 = vadd.f32 %v358_v29, %v228_v33 }
 0x1bb   :  { %v421_v35 = vpop.f32.mrf.mxu1 }
 0x1bc   :  { %v233_v37 = vmax.f32 %v229_v34, 0.0 }
 0x1be   :  { %v250_v38 = vpack.c.bf16 %v233_v37, %v232_v36 }
 0x1c0   :  { %439 = vmatmul.mubr.bf16.vlgmr.msra.gmra.mxu0 %v250_v38 }
 0x280   :  { %v338_v40 = vpop.f32.mrf.mxu0 }
 0x281   :  { %v339_v41 = vadd.f32 %v367_v39, %v338_v40 }
 0x282   :  { %v440_v42 = vpop.f32.mrf.mxu0 }
 0x283   :  { %346 = vst.msk [vmem:[%s596_s3] sm:$0xff] %vm345_vm2, %v339_v41 }
 0x284   :  { %v341_v43 = vpop.f32.mrf.mxu0 }
 0x285   :  { %v342_v44 = vadd.f32 %v367_v39, %v341_v43 }
 0x286   :  { %v441_v45 = vpop.f32.mrf.mxu0 }
 0x287   :  { %347 = vst.msk [vmem:[%s596_s3 + $0x8] sm:$0xff] %vm345_vm2, %v342_v44 }
 0x288   :  { %352 = vsyncpa [#allocation3], 1 }
 0x289   :  { %353 = vsyncpa [#allocation5], 1 }

</bundles_post_ra>
